<compile_context>
chip_gen: v5e
topology: v5e:2x2
jax: 0.10.0
libtpu: 0.0.40
codegen_flags: <defaults>
</compile_context>

<pallas_src>
import functools

import jax
import jax.numpy as jnp
from jax.experimental import pallas as pl
from jax.experimental.pallas import tpu as pltpu

LN_EPS = 1e-5  # torch.nn.LayerNorm default eps


# ----------------------------- activations ---------------------------------
def _apply_activation(y, activation):
    if activation == "tanh":
        return jnp.tanh(y)
    if activation == "bent":
        return (jnp.sqrt(y * y + 1.0) - 1.0) / 2.0 + y
    if activation == "swish":
        return y * jax.nn.sigmoid(y)
    if activation == "relu":
        return jnp.maximum(y, 0.0)
    if activation == "elu":
        return jnp.where(y > 0.0, y, jnp.expm1(y))
    if activation == "identity":
        return y
    raise ValueError(f"unknown activation {activation!r}")


# ------------------------------ fused kernel --------------------------------
def _make_fused_kernel(n_hidden, ln, activation):
    """Builds a kernel that runs the whole MLP stack on one batch tile.

    Ref order: x, then per hidden layer (wt, b[, gamma, beta]),
    then final (wt, b), then the output ref.  Layers are unrolled statically.
    """
    per_hidden = 4 if ln else 2

    def kernel(*refs):
        x_ref = refs[0]
        h = x_ref[...]
        idx = 1
        for _ in range(n_hidden):
            wt_ref = refs[idx]
            b_ref = refs[idx + 1]
            y = jnp.dot(h, wt_ref[...],
                        preferred_element_type=jnp.float32) + b_ref[...]
            y = _apply_activation(y, activation)
            if ln:
                g_ref = refs[idx + 2]
                beta_ref = refs[idx + 3]
                mean = jnp.mean(y, axis=-1, keepdims=True)
                var = jnp.mean((y - mean) ** 2, axis=-1, keepdims=True)  # biased
                inv = jax.lax.rsqrt(var + LN_EPS) * g_ref[...]  # fold gamma in
                y = (y - mean) * inv + beta_ref[...]
            h = y
            idx += per_hidden
        wt_ref = refs[idx]
        b_ref = refs[idx + 1]
        o_ref = refs[idx + 2]
        y = jnp.dot(h, wt_ref[...],
                    preferred_element_type=jnp.float32) + b_ref[...]
        o_ref[...] = y.astype(o_ref.dtype)

    return kernel


def _pick_batch_tile(batch):
    """Largest batch tile (<=512 rows, MXU-friendly) that evenly divides batch.

    512 rows keeps double-buffered activation tiles comfortably under the
    v7x 32 MiB scoped-VMEM default even for wide hidden layers.
    """
    for tm in (512, 256, 128):
        if batch >= tm and batch % tm == 0:
            return tm
    return batch  # small / irregular batch: single whole-array block


# ----------------------------- parameter init -------------------------------
def init_normc(key, out_features, in_features, gain=1.0):
    """Matches init_normc_: N(0,1) rows scaled to norm `gain` along dim 1."""
    w = jax.random.normal(key, (out_features, in_features), dtype=jnp.float32)
    w = w * (gain / jnp.sqrt(jnp.sum(w * w, axis=1, keepdims=True)))
    return w


def make_lnmlp_params(key, input_size, hidden_sizes, output_size,
                      gain=1.0, ln=False):
    """Builds params as LNMLP.__init__ + reset_params would.

    Weights are stored PRE-TRANSPOSED as "wt" with shape (in, out) so the
    kernel computes x @ wt + b with no per-forward transpose.
    """
    params = []
    sizes = [input_size] + list(hidden_sizes)
    keys = jax.random.split(key, len(hidden_sizes) + 1)
    if len(hidden_sizes) > 0:
        for i in range(len(hidden_sizes)):
            w = init_normc(keys[i], sizes[i + 1], sizes[i], gain=gain)
            layer = {"wt": w.T, "b": jnp.zeros((1, sizes[i + 1]), jnp.float32)}
            if ln:
                layer["gamma"] = jnp.ones((1, sizes[i + 1]), jnp.float32)
                layer["beta"] = jnp.zeros((1, sizes[i + 1]), jnp.float32)
            params.append(layer)
        w = init_normc(keys[-1], output_size, hidden_sizes[-1], gain=gain)
        params.append({"wt": w.T, "b": jnp.zeros((1, output_size), jnp.float32)})
    else:
        w = init_normc(keys[-1], output_size, input_size, gain=gain)
        params.append({"wt": w.T, "b": jnp.zeros((1, output_size), jnp.float32)})
    return params


# ------------------------------- forward ------------------------------------
@functools.partial(jax.jit, static_argnames=("activation", "ln"))
def lnmlp_forward(x, params, activation="tanh", ln=False):
    """Pallas implementation of LNMLP.forward.  x: (batch, input_size) f32."""
    batch, in_dim = x.shape
    n_layers = len(params)
    n_hidden = n_layers - 1
    out_dim = params[-1]["wt"].shape[1]

    # Flatten the operand list in the order the kernel expects.
    args = [x]
    in_specs = []
    tm = _pick_batch_tile(batch)
    grid = (batch // tm,)

    # Batch-tiled activation input; streams through VMEM as the grid advances.
    in_specs.append(pl.BlockSpec((tm, in_dim), lambda i: (i, 0)))

    def _resident_spec(arr):
        # Whole-array block, same block for every grid step -> stays in VMEM.
        return pl.BlockSpec(arr.shape, lambda i: (0, 0))

    for li in range(n_hidden):
        layer = params[li]
        args += [layer["wt"], layer["b"]]
        in_specs += [_resident_spec(layer["wt"]), _resident_spec(layer["b"])]
        if ln:
            args += [layer["gamma"], layer["beta"]]
            in_specs += [_resident_spec(layer["gamma"]),
                         _resident_spec(layer["beta"])]
    final = params[-1]
    args += [final["wt"], final["b"]]
    in_specs += [_resident_spec(final["wt"]), _resident_spec(final["b"])]

    kernel = _make_fused_kernel(n_hidden, ln, activation)

    return pl.pallas_call(
        kernel,
        out_shape=jax.ShapeDtypeStruct((batch, out_dim), jnp.float32),
        grid=grid,
        in_specs=in_specs,
        out_specs=pl.BlockSpec((tm, out_dim), lambda i: (i, 0)),
        compiler_params=pltpu.CompilerParams(
            dimension_semantics=("parallel",)),  # megacore sharding on v7x
    )(*args)


# -------------------------- pure-JAX reference -------------------------------
def lnmlp_reference(x, params, activation="tanh", ln=False):
    h = x
    n_layers = len(params)
    for i, layer in enumerate(params):
        h = h @ layer["wt"] + layer["b"]
        is_last = i == n_layers - 1
        if not is_last:
            h = _apply_activation(h, activation)
            if ln:
                mean = jnp.mean(h, axis=-1, keepdims=True)
                var = jnp.mean((h - mean) ** 2, axis=-1, keepdims=True)
                h = (h - mean) / jnp.sqrt(var + LN_EPS)
                h = h * layer["gamma"] + layer["beta"]
    return h


# --------------------------------- main --------------------------------------
if __name__ == "__main__":
    key = jax.random.PRNGKey(0)

    def _check(batch, input_size, hidden_sizes, output_size, activation, ln,
               seed):
        k_x, k_p = jax.random.split(jax.random.PRNGKey(seed))
        x = jax.random.normal(k_x, (batch, input_size), dtype=jnp.float32)
        params = make_lnmlp_params(k_p, input_size, hidden_sizes, output_size,
                                   gain=1.0, ln=ln)
        out = lnmlp_forward(x, params, activation=activation, ln=ln)
        out = jax.block_until_ready(out)
        ref = lnmlp_reference(x, params, activation=activation, ln=ln)
        assert out.shape == (batch, output_size)
        assert jnp.allclose(out, ref, atol=1e-5, rtol=1e-5), (
            f"mismatch vs reference (act={activation}, ln={ln}, "
            f"hidden={hidden_sizes}, batch={batch})")

    # Primary small config (matches the module's typical use).
    _check(batch=8, input_size=16, hidden_sizes=(32, 32), output_size=8,
           activation="tanh", ln=True, seed=0)
    # No-LayerNorm path with a different activation.
    _check(batch=8, input_size=16, hidden_sizes=(32, 32), output_size=8,
           activation="swish", ln=False, seed=1)
    # hidden_sizes == (): single Linear, no activation.
    _check(batch=8, input_size=16, hidden_sizes=(), output_size=8,
           activation="tanh", ln=False, seed=2)
    # Larger batch exercising the batch-tiled "parallel" grid (grid = 2).
    _check(batch=1024, input_size=16, hidden_sizes=(32, 32), output_size=8,
           activation="tanh", ln=True, seed=3)

    print("KERNEL_OK")
</pallas_src>

<mosaic_0001>
module attributes {stable_mosaic.version = 11 : i64} {
  func.func @kernel(%arg0: i32, %arg1: memref<8x16xf32, #tpu.memory_space<vmem>>, %arg2: memref<16x32xf32, #tpu.memory_space<vmem>>, %arg3: memref<1x32xf32, #tpu.memory_space<vmem>>, %arg4: memref<1x32xf32, #tpu.memory_space<vmem>>, %arg5: memref<1x32xf32, #tpu.memory_space<vmem>>, %arg6: memref<32x32xf32, #tpu.memory_space<vmem>>, %arg7: memref<1x32xf32, #tpu.memory_space<vmem>>, %arg8: memref<1x32xf32, #tpu.memory_space<vmem>>, %arg9: memref<1x32xf32, #tpu.memory_space<vmem>>, %arg10: memref<32x8xf32, #tpu.memory_space<vmem>>, %arg11: memref<1x8xf32, #tpu.memory_space<vmem>>, %arg12: memref<8x8xf32, #tpu.memory_space<vmem>>) attributes {dimension_semantics = [#tpu.dimension_semantics<parallel>], iteration_bounds = array<i64: 1>, scalar_prefetch = 0 : i64, scratch_operands = 0 : i64, tpu.core_type = #tpu.core_type<tc>, window_params = [{transform_indices = @transform_0, window_bounds = array<i64: 8, 16>}, {pipeline_mode = #tpu.pipeline_mode<synchronous>, transform_indices = @transform_1, window_bounds = array<i64: 16, 32>}, {pipeline_mode = #tpu.pipeline_mode<synchronous>, transform_indices = @transform_2, window_bounds = array<i64: 1, 32>}, {pipeline_mode = #tpu.pipeline_mode<synchronous>, transform_indices = @transform_3, window_bounds = array<i64: 1, 32>}, {pipeline_mode = #tpu.pipeline_mode<synchronous>, transform_indices = @transform_4, window_bounds = array<i64: 1, 32>}, {pipeline_mode = #tpu.pipeline_mode<synchronous>, transform_indices = @transform_5, window_bounds = array<i64: 32, 32>}, {pipeline_mode = #tpu.pipeline_mode<synchronous>, transform_indices = @transform_6, window_bounds = array<i64: 1, 32>}, {pipeline_mode = #tpu.pipeline_mode<synchronous>, transform_indices = @transform_7, window_bounds = array<i64: 1, 32>}, {pipeline_mode = #tpu.pipeline_mode<synchronous>, transform_indices = @transform_8, window_bounds = array<i64: 1, 32>}, {pipeline_mode = #tpu.pipeline_mode<synchronous>, transform_indices = @transform_9, window_bounds = array<i64: 32, 8>}, {pipeline_mode = #tpu.pipeline_mode<synchronous>, transform_indices = @transform_10, window_bounds = array<i64: 1, 8>}, {transform_indices = @transform_11, window_bounds = array<i64: 8, 8>}]} {
    %c0 = arith.constant 0 : index
    %c0_0 = arith.constant 0 : index
    %0 = vector.load %arg1[%c0, %c0_0] : memref<8x16xf32, #tpu.memory_space<vmem>>, vector<8x16xf32>
    %c0_1 = arith.constant 0 : index
    %c0_2 = arith.constant 0 : index
    %1 = vector.load %arg2[%c0_1, %c0_2] : memref<16x32xf32, #tpu.memory_space<vmem>>, vector<16x32xf32>
    %cst = arith.constant dense<0.000000e+00> : vector<8x32xf32>
    %2 = tpu.matmul %0, %1, %cst {dimension_numbers = #tpu.dot_dimension_numbers<[1], [0], [0], [1], [0, 0, 1, 1], [], []>} : vector<8x16xf32>, vector<16x32xf32>, vector<8x32xf32> -> vector<8x32xf32>
    %c0_3 = arith.constant 0 : index
    %c0_4 = arith.constant 0 : index
    %3 = vector.load %arg3[%c0_3, %c0_4] : memref<1x32xf32, #tpu.memory_space<vmem>>, vector<1x32xf32>
    %4 = vector.broadcast %3 : vector<1x32xf32> to vector<8x32xf32>
    %5 = arith.addf %2, %4 : vector<8x32xf32>
    %6 = math.tanh %5 : vector<8x32xf32>
    %cst_5 = arith.constant dense<0.000000e+00> : vector<8xf32>
    %7 = vector.multi_reduction <add>, %6, %cst_5 [1] : vector<8x32xf32> to vector<8xf32>
    %8 = vector.shape_cast %7 : vector<8xf32> to vector<8x1xf32>
    %cst_6 = arith.constant 3.200000e+01 : f32
    %9 = vector.broadcast %cst_6 : f32 to vector<8x1xf32>
    %10 = arith.divf %8, %9 : vector<8x1xf32>
    %11 = vector.broadcast %10 : vector<8x1xf32> to vector<8x32xf32>
    %12 = arith.subf %6, %11 : vector<8x32xf32>
    %13 = arith.mulf %12, %12 : vector<8x32xf32>
    %cst_7 = arith.constant dense<0.000000e+00> : vector<8xf32>
    %14 = vector.multi_reduction <add>, %13, %cst_7 [1] : vector<8x32xf32> to vector<8xf32>
    %15 = vector.shape_cast %14 : vector<8xf32> to vector<8x1xf32>
    %cst_8 = arith.constant 3.200000e+01 : f32
    %16 = vector.broadcast %cst_8 : f32 to vector<8x1xf32>
    %17 = arith.divf %15, %16 : vector<8x1xf32>
    %cst_9 = arith.constant 9.99999974E-6 : f32
    %18 = vector.broadcast %cst_9 : f32 to vector<8x1xf32>
    %19 = arith.addf %17, %18 : vector<8x1xf32>
    %20 = math.rsqrt %19 : vector<8x1xf32>
    %c0_10 = arith.constant 0 : index
    %c0_11 = arith.constant 0 : index
    %21 = vector.load %arg4[%c0_10, %c0_11] : memref<1x32xf32, #tpu.memory_space<vmem>>, vector<1x32xf32>
    %22 = vector.broadcast %20 : vector<8x1xf32> to vector<8x32xf32>
    %23 = vector.broadcast %21 : vector<1x32xf32> to vector<8x32xf32>
    %24 = arith.mulf %22, %23 : vector<8x32xf32>
    %25 = vector.broadcast %10 : vector<8x1xf32> to vector<8x32xf32>
    %26 = arith.subf %6, %25 : vector<8x32xf32>
    %27 = arith.mulf %26, %24 : vector<8x32xf32>
    %c0_12 = arith.constant 0 : index
    %c0_13 = arith.constant 0 : index
    %28 = vector.load %arg5[%c0_12, %c0_13] : memref<1x32xf32, #tpu.memory_space<vmem>>, vector<1x32xf32>
    %29 = vector.broadcast %28 : vector<1x32xf32> to vector<8x32xf32>
    %30 = arith.addf %27, %29 : vector<8x32xf32>
    %c0_14 = arith.constant 0 : index
    %c0_15 = arith.constant 0 : index
    %31 = vector.load %arg6[%c0_14, %c0_15] : memref<32x32xf32, #tpu.memory_space<vmem>>, vector<32x32xf32>
    %cst_16 = arith.constant dense<0.000000e+00> : vector<8x32xf32>
    %32 = tpu.matmul %30, %31, %cst_16 {dimension_numbers = #tpu.dot_dimension_numbers<[1], [0], [0], [1], [0, 0, 1, 1], [], []>} : vector<8x32xf32>, vector<32x32xf32>, vector<8x32xf32> -> vector<8x32xf32>
    %c0_17 = arith.constant 0 : index
    %c0_18 = arith.constant 0 : index
    %33 = vector.load %arg7[%c0_17, %c0_18] : memref<1x32xf32, #tpu.memory_space<vmem>>, vector<1x32xf32>
    %34 = vector.broadcast %33 : vector<1x32xf32> to vector<8x32xf32>
    %35 = arith.addf %32, %34 : vector<8x32xf32>
    %36 = math.tanh %35 : vector<8x32xf32>
    %cst_19 = arith.constant dense<0.000000e+00> : vector<8xf32>
    %37 = vector.multi_reduction <add>, %36, %cst_19 [1] : vector<8x32xf32> to vector<8xf32>
    %38 = vector.shape_cast %37 : vector<8xf32> to vector<8x1xf32>
    %cst_20 = arith.constant 3.200000e+01 : f32
    %39 = vector.broadcast %cst_20 : f32 to vector<8x1xf32>
    %40 = arith.divf %38, %39 : vector<8x1xf32>
    %41 = vector.broadcast %40 : vector<8x1xf32> to vector<8x32xf32>
    %42 = arith.subf %36, %41 : vector<8x32xf32>
    %43 = arith.mulf %42, %42 : vector<8x32xf32>
    %cst_21 = arith.constant dense<0.000000e+00> : vector<8xf32>
    %44 = vector.multi_reduction <add>, %43, %cst_21 [1] : vector<8x32xf32> to vector<8xf32>
    %45 = vector.shape_cast %44 : vector<8xf32> to vector<8x1xf32>
    %cst_22 = arith.constant 3.200000e+01 : f32
    %46 = vector.broadcast %cst_22 : f32 to vector<8x1xf32>
    %47 = arith.divf %45, %46 : vector<8x1xf32>
    %cst_23 = arith.constant 9.99999974E-6 : f32
    %48 = vector.broadcast %cst_23 : f32 to vector<8x1xf32>
    %49 = arith.addf %47, %48 : vector<8x1xf32>
    %50 = math.rsqrt %49 : vector<8x1xf32>
    %c0_24 = arith.constant 0 : index
    %c0_25 = arith.constant 0 : index
    %51 = vector.load %arg8[%c0_24, %c0_25] : memref<1x32xf32, #tpu.memory_space<vmem>>, vector<1x32xf32>
    %52 = vector.broadcast %50 : vector<8x1xf32> to vector<8x32xf32>
    %53 = vector.broadcast %51 : vector<1x32xf32> to vector<8x32xf32>
    %54 = arith.mulf %52, %53 : vector<8x32xf32>
    %55 = vector.broadcast %40 : vector<8x1xf32> to vector<8x32xf32>
    %56 = arith.subf %36, %55 : vector<8x32xf32>
    %57 = arith.mulf %56, %54 : vector<8x32xf32>
    %c0_26 = arith.constant 0 : index
    %c0_27 = arith.constant 0 : index
    %58 = vector.load %arg9[%c0_26, %c0_27] : memref<1x32xf32, #tpu.memory_space<vmem>>, vector<1x32xf32>
    %59 = vector.broadcast %58 : vector<1x32xf32> to vector<8x32xf32>
    %60 = arith.addf %57, %59 : vector<8x32xf32>
    %c0_28 = arith.constant 0 : index
    %c0_29 = arith.constant 0 : index
    %61 = vector.load %arg10[%c0_28, %c0_29] : memref<32x8xf32, #tpu.memory_space<vmem>>, vector<32x8xf32>
    %cst_30 = arith.constant dense<0.000000e+00> : vector<8x8xf32>
    %62 = tpu.matmul %60, %61, %cst_30 {dimension_numbers = #tpu.dot_dimension_numbers<[1], [0], [0], [1], [0, 0, 1, 1], [], []>} : vector<8x32xf32>, vector<32x8xf32>, vector<8x8xf32> -> vector<8x8xf32>
    %c0_31 = arith.constant 0 : index
    %c0_32 = arith.constant 0 : index
    %63 = vector.load %arg11[%c0_31, %c0_32] : memref<1x8xf32, #tpu.memory_space<vmem>>, vector<1x8xf32>
    %64 = vector.broadcast %63 : vector<1x8xf32> to vector<8x8xf32>
    %65 = arith.addf %62, %64 : vector<8x8xf32>
    %c0_33 = arith.constant 0 : index
    %c0_34 = arith.constant 0 : index
    %66 = vector.load %arg12[%c0_33, %c0_34] : memref<8x8xf32, #tpu.memory_space<vmem>>, vector<8x8xf32>
    tpu.vector_store %arg12[%c0_33, %c0_34], %65 {strides = array<i32>} : memref<8x8xf32, #tpu.memory_space<vmem>>, vector<8x8xf32>,
    return
  }
  func.func @transform_0(%arg0: i32) -> (i32, i32) {
    %c0_i32 = arith.constant 0 : i32
    %c0_i32_0 = arith.constant 0 : i32
    return %arg0, %c0_i32 : i32, i32
  }
  func.func @transform_1(%arg0: i32) -> (i32, i32) {
    %c0_i32 = arith.constant 0 : i32
    %c0_i32_0 = arith.constant 0 : i32
    %c0_i32_1 = arith.constant 0 : i32
    return %c0_i32, %c0_i32_0 : i32, i32
  }
  func.func @transform_2(%arg0: i32) -> (i32, i32) {
    %c0_i32 = arith.constant 0 : i32
    %c0_i32_0 = arith.constant 0 : i32
    %c0_i32_1 = arith.constant 0 : i32
    return %c0_i32, %c0_i32_0 : i32, i32
  }
  func.func @transform_3(%arg0: i32) -> (i32, i32) {
    %c0_i32 = arith.constant 0 : i32
    %c0_i32_0 = arith.constant 0 : i32
    %c0_i32_1 = arith.constant 0 : i32
    return %c0_i32, %c0_i32_0 : i32, i32
  }
  func.func @transform_4(%arg0: i32) -> (i32, i32) {
    %c0_i32 = arith.constant 0 : i32
    %c0_i32_0 = arith.constant 0 : i32
    %c0_i32_1 = arith.constant 0 : i32
    return %c0_i32, %c0_i32_0 : i32, i32
  }
  func.func @transform_5(%arg0: i32) -> (i32, i32) {
    %c0_i32 = arith.constant 0 : i32
    %c0_i32_0 = arith.constant 0 : i32
    %c0_i32_1 = arith.constant 0 : i32
    return %c0_i32, %c0_i32_0 : i32, i32
  }
  func.func @transform_6(%arg0: i32) -> (i32, i32) {
    %c0_i32 = arith.constant 0 : i32
    %c0_i32_0 = arith.constant 0 : i32
    %c0_i32_1 = arith.constant 0 : i32
    return %c0_i32, %c0_i32_0 : i32, i32
  }
  func.func @transform_7(%arg0: i32) -> (i32, i32) {
    %c0_i32 = arith.constant 0 : i32
    %c0_i32_0 = arith.constant 0 : i32
    %c0_i32_1 = arith.constant 0 : i32
    return %c0_i32, %c0_i32_0 : i32, i32
  }
  func.func @transform_8(%arg0: i32) -> (i32, i32) {
    %c0_i32 = arith.constant 0 : i32
    %c0_i32_0 = arith.constant 0 : i32
    %c0_i32_1 = arith.constant 0 : i32
    return %c0_i32, %c0_i32_0 : i32, i32
  }
  func.func @transform_9(%arg0: i32) -> (i32, i32) {
    %c0_i32 = arith.constant 0 : i32
    %c0_i32_0 = arith.constant 0 : i32
    %c0_i32_1 = arith.constant 0 : i32
    return %c0_i32, %c0_i32_0 : i32, i32
  }
  func.func @transform_10(%arg0: i32) -> (i32, i32) {
    %c0_i32 = arith.constant 0 : i32
    %c0_i32_0 = arith.constant 0 : i32
    %c0_i32_1 = arith.constant 0 : i32
    return %c0_i32, %c0_i32_0 : i32, i32
  }
  func.func @transform_11(%arg0: i32) -> (i32, i32) {
    %c0_i32 = arith.constant 0 : i32
    %c0_i32_0 = arith.constant 0 : i32
    return %arg0, %c0_i32 : i32, i32
  }
}

</mosaic_0001>

<bundles_post_ra>
// kernel: lnmlp_forward.1
= control target key start
LH: loop header
LB: loop body
LE: loop exit
PB: predicated region body
PF: predicated region fallthrough
CT: control target
= control target key end

     0   :  { %16 = vsyncpa [#allocation3], 0  ;;  %s689_s0 = inlined_call_operand.vmem [shape: f32[8,16], index: 0, kind: input, shape index: {}]   ;;  %s690_s1 = inlined_call_operand.hbm [shape: f32[16,32], index: 1, kind: input, shape index: {}]   ;;  %s691_s2 = inlined_call_operand.vmem [shape: f32[1,32], index: 2, kind: input, shape index: {}]   ;;  %s692_s3 = inlined_call_operand.hbm [shape: f32[1,32], index: 3, kind: input, shape index: {}]   ;;  %s693_s4 = inlined_call_operand.hbm [shape: f32[1,32], index: 4, kind: input, shape index: {}]   ;;  %s694_s5 = inlined_call_operand.vmem [shape: f32[32,32], index: 5, kind: input, shape index: {}]   ;;  %s695_s6 = inlined_call_operand.hbm [shape: f32[1,32], index: 6, kind: input, shape index: {}]   ;;  %s696_s7 = inlined_call_operand.hbm [shape: f32[1,32], index: 7, kind: input, shape index: {}]   ;;  %s697_s8 = inlined_call_operand.hbm [shape: f32[1,32], index: 8, kind: input, shape index: {}]   ;;  %s698_s9 = inlined_call_operand.vmem [shape: f32[32,8], index: 9, kind: input, shape index: {}]   ;;  %s699_s10 = inlined_call_operand.hbm [shape: f32[1,8], index: 10, kind: input, shape index: {}]   ;;  %s700_s11 = inlined_call_operand.hbm [shape: f32[8,8], index: 11, kind: output, shape index: {}]  }
   0x1   :  { %17 = vsyncpa [#allocation6], 0 }
   0x2   :  { %18 = vsyncpa [#allocation9], 0 }
   0x3   :  { %19 = vsyncpa [#allocation12], 0  ;;  %s43_s19 = sshll.u32 %s692_s3, 4  ;;  %s44_s19 = int_to_ptr.hbm [resolvable:$true] %s43_s19 }
   0x4   :  { %20 = vsyncpa [#allocation4], 0  ;;  %s558_s20 = smov [#allocation5]   ;;  %s67_s24 = sshll.u32 %s695_s6, 4  ;;  %s68_s24 = int_to_ptr.hbm [resolvable:$true] %s67_s24 }
   0x5   :  { %s45_s21 = sshll.u32 %s558_s20, 4  ;;  %s559_s25 = smov [#allocation8]   ;;  %s46_s21 = int_to_ptr.vmem [resolvable:$true] %s45_s21 }
   0x6   :  { %48 = dma.hbm_to_vmem [thread:$0]  %s44_s19, 16, %s46_s21, [#allocation6]  }
   0x7   :  { %s69_s26 = sshll.u32 %s559_s25, 4  ;;  %s89_s29 = sshll.u32 %s697_s8, 4  ;;  %s70_s26 = int_to_ptr.vmem [resolvable:$true] %s69_s26  ;;  %s90_s29 = int_to_ptr.hbm [resolvable:$true] %s89_s29 }
   0x8   :  { %72 = dma.hbm_to_vmem [thread:$0]  %s68_s24, 16, %s70_s26, [#allocation9]  }
   0x9   :  { %s27_s12 = sshll.u32 %s690_s1, 4  ;;  %s560_s13 = smov [#allocation11]   ;;  %s28_s12 = int_to_ptr.hbm [resolvable:$true] %s27_s12 }
   0xa   :  { %s91_s14 = sshll.u32 %s560_s13, 4  ;;  %s561_s6 = smov [#allocation2]   ;;  %s92_s14 = int_to_ptr.vmem [resolvable:$true] %s91_s14 }
   0xb   :  { %94 = dma.hbm_to_vmem [thread:$0]  %s90_s29, 16, %s92_s14, [#allocation12]  }
   0xc   :  { %s29_s15 = sshll.u32 %s561_s6, 4  ;;  %s562_s16 = smov 128   ;;  %s30_s15 = int_to_ptr.vmem [resolvable:$true] %s29_s15 }
   0xd   :  { %s563_s17 = smov 8   ;;  %s54_s19 = sshll.u32 %s693_s4, 4  ;;  %s55_s19 = int_to_ptr.hbm [resolvable:$true] %s54_s19 }
   0xe   :  { %35 = dma.hbm_to_vmem [thread:$0]  %s28_s12, 256, %s30_s15, [#allocation3], %s562_s16, %s562_s16, %s563_s17  }
   0xf   :  { %s564_s20 = smov [#allocation7]   ;;  %s78_s23 = sshll.u32 %s696_s7, 4  ;;  %s79_s23 = int_to_ptr.hbm [resolvable:$true] %s78_s23 }
  0x10   :  { %s56_s21 = sshll.u32 %s564_s20, 4  ;;  %s565_s24 = smov [#allocation10]   ;;  %s57_s21 = int_to_ptr.vmem [resolvable:$true] %s56_s21 }
  0x11   :  { %59 = dma.hbm_to_vmem [thread:$0]  %s55_s19, 16, %s57_s21, [#allocation6]  }
  0x12   :  { %s80_s25 = sshll.u32 %s565_s24, 4  ;;  %s102_s28 = sshll.u32 %s699_s10, 4  ;;  %s81_s25 = int_to_ptr.vmem [resolvable:$true] %s80_s25  ;;  %s103_s28 = int_to_ptr.hbm [resolvable:$true] %s102_s28 }
  0x13   :  { %83 = dma.hbm_to_vmem [thread:$0]  %s79_s23, 16, %s81_s25, [#allocation9]  }
  0x14   :  { %s566_s4 = smov [#allocation13]  }
  0x15   :  { %s104_s29 = sshll.u32 %s566_s4, 4  ;;  %s105_s29 = int_to_ptr.vmem [resolvable:$true] %s104_s29 }
  0x16   :  { %107 = dma.hbm_to_vmem [thread:$0]  %s103_s28, 16, %s105_s29, [#allocation12]  }
  0x17   :  { %548 = dma.done.wait [#allocation3], 256  }
  0x18   :  { %549 = vsyncadd [#allocation3], 4294967040 }
  0x19   :  { %550 = dma.done.wait [#allocation6], 32  }
  0x1a   :  { %551 = vsyncadd [#allocation6], 4294967264 }
  0x1b   :  { %552 = dma.done.wait [#allocation9], 32  }
  0x1c   :  { %553 = vsyncadd [#allocation9], 4294967264 }
  0x1d   :  { %554 = dma.done.wait [#allocation12], 32  }
  0x1e   :  { %555 = vsyncadd [#allocation12], 4294967264  ;;  %v138_v0 = vld [vmem:[#allocation2 + $0x8] sm:$0xff]  ;;  %v137_v1 = vld [vmem:[#allocation2] sm:$0xff]  ;;  %vm143_vm0 = vcmask 130048   ;;  %vm168_vm1 = vcmask 261120  }
  0x1f   :  { %161 = vmatpush.msra.mxu0 %v138_v0  ;;  %v136_v2 = vld [vmem:[%s689_s0] sm:$0xff]  ;;  %v567_v8 = vmov 32.0   ;;  %v211_v20 = vld [vmem:[%s694_s5 + $0x18] sm:$0xff]  ;;  %v210_v21 = vld [vmem:[%s694_s5 + $0x10] sm:$0xff]  ;;  %s312_s25 = sshll.u32 %s700_s11, 4  ;;  %vm303_vm9 = vcmask 64512   ;;  %s313_s25 = int_to_ptr.hbm [resolvable:$true] %s312_s25 }
  0x20   :  { %v339_v3 = vld [vmem:[%s691_s2] ss:$0 sm:$0xff]  ;;  %231 = vmatpush.msra.mxu1 %v211_v20  ;;  %v209_v22 = vld [vmem:[%s694_s5 + $0x8] sm:$0xff]  ;;  %v340_v32 = vld [vmem:[#allocation5] ss:$0 sm:$0xff] }
  0x21   :  { %162 = vmatpush.msra.mxu0 %v137_v1  ;;  %v208_v23 = vld [vmem:[%s694_s5] sm:$0xff]  ;;  %v341_v36 = vld [vmem:[#allocation7] ss:$0 sm:$0xff]  ;;  %v342_v39 = vld [vmem:[#allocation8] ss:$0 sm:$0xff] }
  0x22   :  { %325 = vmatmul.msk.f32.vlgmr.msra.gmra.mxu0 %vm143_vm0, %v136_v2  ;;  %232 = vmatpush.msra.mxu1 %v210_v21  ;;  %v275_v49 = vld [vmem:[%s698_s9 + $0x18] sm:$0xff]  ;;  %v274_v50 = vld [vmem:[%s698_s9 + $0x10] sm:$0xff]  ;;  %v273_v51 = vld [vmem:[%s698_s9 + $0x8] sm:$0xff] }
  0x23   :  { %295 = vmatpush.msra.mxu2 %v275_v49  ;;  %v272_v52 = vld [vmem:[%s698_s9] sm:$0xff]  ;;  %v343_v61 = vld [vmem:[#allocation10] ss:$0 sm:$0xff]  ;;  %v344_v1 = vld [vmem:[#allocation11] ss:$0 sm:$0xff]  ;;  %s568_s9 = smov [#allocation14]  }
  0x24   :  { %233 = vmatpush.msra.mxu1 %v209_v22  ;;  %s310_s22 = sshll.u32 %s568_s9, 4  ;;  %s311_s22 = int_to_ptr.vmem [resolvable:$true] %s310_s22 }
  0x25   :  { %296 = vmatpush.msra.mxu2 %v274_v50 }
  0x26   :  { %234 = vmatpush.msra.mxu1 %v208_v23 }
  0x27   :  { %297 = vmatpush.msra.mxu2 %v273_v51 }
  0x29   :  { %298 = vmatpush.msra.mxu2 %v272_v52 }
  0x9f   :  { %v164_v4 = vpop.f32.mrf.mxu0 }
  0xa0   :  { %v165_v5 = vadd.f32 %v339_v3, %v164_v4  ;;  %v345_v4 = vld [vmem:[#allocation13] ss:$0 sm:$0xff] }
  0xa2   :  { %346 = vtanh.f32 %v165_v5 }
  0xa3   :  { %348 = vrcp.f32 %v567_v8 }
  0xa8   :  { %v347_v6 = vpop.eup %346 }
  0xa9   :  { %v169_v7 = vsel %vm168_vm1, %v347_v6, 0.0  ;;  %v349_v9 = vpop.eup %348 }
  0xaa   :  { %170 = vadd.xlane.f32.xlu0 %v169_v7  ;;  %v173_v10 = vmul.f32 32.0, %v349_v9  ;;  %vm177_vm2 = vweird.f32 %v349_v9 }
  0xac   :  { %v174_v11 = vsub.f32 1.0, %v173_v10 }
  0xae   :  { %v175_v12 = vmul.f32 %v349_v9, %v174_v11 }
  0xb0   :  { %v176_v13 = vadd.f32 %v349_v9, %v175_v12 }
  0xb2   :  { %v178_v14 = vsel %vm177_vm2, %v349_v9, %v176_v13 }
 0x11d   :  { %v171_v15 = vpop.xlane.xlu0 %170 }
 0x11e   :  { %v179_v16 = vmul.f32 %v178_v14, %v171_v15 }
 0x120   :  { %v180_v17 = vsub.f32 %v347_v6, %v179_v16 }
 0x122   :  { %v181_v18 = vmul.f32 %v180_v17, %v180_v17 }
 0x124   :  { %v182_v19 = vsel %vm168_vm1, %v181_v18, 0.0 }
 0x125   :  { %183 = vadd.xlane.f32.xlu0 %v182_v19 }
 0x198   :  { %v184_v24 = vpop.xlane.xlu0 %183 }
 0x199   :  { %v185_v25 = vmul.f32 %v184_v24, %v178_v14 }
 0x19b   :  { %v186_v26 = vadd.f32 1e-05, %v185_v25 }
 0x19d   :  { %350 = vrsqrt.f32 %v186_v26  ;;  %vm193_vm4 = vweird.f32 %v186_v26 }
 0x1a3   :  { %v351_v27 = vpop.eup %350 }
 0x1a4   :  { %v188_v28 = vmul.f32 %v351_v27, %v186_v26  ;;  %vm194_vm3 = vweird.f32 %v351_v27 }
 0x1a5   :  { %vm195_vm5 = vmor %vm193_vm4, %vm194_vm3 }
 0x1a6   :  { %v189_v29 = vmul.f32 %v351_v27, %v188_v28 }
 0x1a8   :  { %v190_v30 = vmul.f32 0.5, %v189_v29 }
 0x1aa   :  { %v191_v31 = vsub.f32 1.5, %v190_v30 }
 0x1ac   :  { %v192_v33 = vmul.f32 %v351_v27, %v191_v31 }
 0x1ae   :  { %v196_v34 = vsel %vm195_vm5, %v351_v27, %v192_v33 }
 0x1af   :  { %v201_v35 = vmul.f32 %v340_v32, %v196_v34 }
 0x1b1   :  { %v202_v37 = vmul.f32 %v201_v35, %v180_v17 }
 0x1b3   :  { %v207_v38 = vadd.f32 %v341_v36, %v202_v37 }
 0x1b5   :  { %326 = vmatmul.msk.f32.vlgmr.msra.gmra.mxu1 %vm168_vm1, %v207_v38 }
 0x232   :  { %v236_v40 = vpop.f32.mrf.mxu1 }
 0x233   :  { %v237_v41 = vadd.f32 %v342_v39, %v236_v40 }
 0x235   :  { %352 = vtanh.f32 %v237_v41 }
 0x23b   :  { %v353_v42 = vpop.eup %352 }
 0x23c   :  { %v240_v43 = vsel %vm168_vm1, %v353_v42, 0.0 }
 0x23d   :  { %241 = vadd.xlane.f32.xlu1 %v240_v43 }
 0x2b0   :  { %v242_v44 = vpop.xlane.xlu1 %241 }
 0x2b1   :  { %v243_v45 = vmul.f32 %v242_v44, %v178_v14 }
 0x2b3   :  { %v244_v46 = vsub.f32 %v353_v42, %v243_v45 }
 0x2b5   :  { %v245_v47 = vmul.f32 %v244_v46, %v244_v46 }
 0x2b7   :  { %v246_v48 = vsel %vm168_vm1, %v245_v47, 0.0 }
 0x2b8   :  { %247 = vadd.xlane.f32.xlu1 %v246_v48 }
 0x32b   :  { %v248_v53 = vpop.xlane.xlu1 %247 }
 0x32c   :  { %v249_v54 = vmul.f32 %v248_v53, %v178_v14 }
 0x32e   :  { %v250_v55 = vadd.f32 1e-05, %v249_v54 }
 0x330   :  { %354 = vrsqrt.f32 %v250_v55  ;;  %vm257_vm7 = vweird.f32 %v250_v55 }
 0x336   :  { %v355_v56 = vpop.eup %354 }
 0x337   :  { %v252_v57 = vmul.f32 %v355_v56, %v250_v55  ;;  %vm258_vm6 = vweird.f32 %v355_v56 }
 0x338   :  { %vm259_vm8 = vmor %vm257_vm7, %vm258_vm6 }
 0x339   :  { %v253_v58 = vmul.f32 %v355_v56, %v252_v57 }
 0x33b   :  { %v254_v59 = vmul.f32 0.5, %v253_v58 }
 0x33d   :  { %v255_v60 = vsub.f32 1.5, %v254_v59 }
 0x33f   :  { %v256_v62 = vmul.f32 %v355_v56, %v255_v60 }
 0x341   :  { %v260_v63 = vsel %vm259_vm8, %v355_v56, %v256_v62 }
 0x342   :  { %v265_v0 = vmul.f32 %v343_v61, %v260_v63 }
 0x344   :  { %v266_v2 = vmul.f32 %v265_v0, %v244_v46 }
 0x346   :  { %v271_v3 = vadd.f32 %v344_v1, %v266_v2 }
 0x348   :  { %327 = vmatmul.msk.f32.vlgmr.msra.gmra.mxu2 %vm168_vm1, %v271_v3 }
 0x3cb   :  { %v300_v5 = vpop.f32.mrf.mxu2 }
 0x3cc   :  { %v301_v6 = vadd.f32 %v345_v4, %v300_v5 }
 0x3ce   :  { %304 = vst.msk [vmem:[#allocation14] sm:$0xff] %vm303_vm9, %v301_v6 }
 0x3cf   :  { %315 = dma.vmem_to_hbm [thread:$0]  %s311_s22, 128, %s313_s25, [#allocation4]  }
 0x3d0   :  { %556 = dma.done.wait [#allocation4], 128  }
 0x3d1   :  { %557 = vsyncadd [#allocation4], 4294967168 }
 0x3d2   :  { %320 = vsyncpa [#allocation3], 1 }
 0x3d3   :  { %321 = vsyncpa [#allocation6], 1 }
 0x3d4   :  { %322 = vsyncpa [#allocation9], 1 }
 0x3d5   :  { %323 = vsyncpa [#allocation12], 1 }
 0x3d6   :  { %324 = vsyncpa [#allocation4], 1 }

</bundles_post_ra>
